<compile_context>
chip_gen: v6e
topology: v6e:2x2x1
jax: 0.10.0
libtpu: 0.0.40
codegen_flags: <defaults>
</compile_context>

<pallas_src>
import jax
import jax.numpy as jnp
from jax.experimental import pallas as pl
from jax.experimental.pallas import tpu as pltpu


def _round_up(x, m):
    return (x + m - 1) // m * m


def _erf(x):
    # Abramowitz & Stegun 7.1.26 rational approximation, max abs error 1.5e-7.
    # Uses only ops with guaranteed Mosaic lowerings (exp -> EUP, rest -> VPU).
    a1 = 0.254829592
    a2 = -0.284496736
    a3 = 1.421413741
    a4 = -1.453152027
    a5 = 1.061405429
    p = 0.3275911
    ax = jnp.abs(x)
    t = 1.0 / (1.0 + p * ax)
    poly = ((((a5 * t + a4) * t + a3) * t + a2) * t + a1) * t
    y = 1.0 - poly * jnp.exp(-ax * ax)
    return jnp.where(x >= 0.0, y, -y)


def _gelu_exact(x):
    # PyTorch nn.GELU() default is the exact (erf-based) formulation.
    return 0.5 * x * (1.0 + _erf(x * 0.7071067811865476))


def pointwise_attention_kernel(hist_ref, tgt_ref, bias_ref, wh_ref, wp_ref,
                               w2_ref, b2_ref, out_ref):
    B, TT, D = hist_ref.shape

    hist = hist_ref[...].astype(jnp.float32)          # (B, TT, D)
    tgt = tgt_ref[...].astype(jnp.float32)            # (B, 1, D) -> broadcast over TT
    prod = hist * tgt                                 # (B, TT, D)

    wh = wh_ref[...].astype(jnp.float32)              # (D, D)  history coefficient
    wp = wp_ref[...].astype(jnp.float32)              # (D, D)  prod coefficient

    # Leading-dim merge is layout-trivial (last dim unchanged, TT is a multiple of 8)
    # -> plain 2D MXU matmuls over B*TT rows.
    hist2 = hist.reshape(B * TT, D)
    prod2 = prod.reshape(B * TT, D)
    h = jnp.dot(hist2, wh, preferred_element_type=jnp.float32)
    h = h + jnp.dot(prod2, wp, preferred_element_type=jnp.float32)

    # Per-batch bias already contains b1 + target_b @ (W1b + W1c)  (hoisted in wrapper).
    h = h.reshape(B, TT, D) + bias_ref[...].astype(jnp.float32)   # (B, 1, D) broadcast
    h = _gelu_exact(h)

    # fc2 (D -> 1) as VPU multiply + lane (XLU) reduction; keeps the output lane-dense.
    w2_row = w2_ref[...].astype(jnp.float32).reshape(1, 1, D)
    out = jnp.sum(h * w2_row, axis=-1)                # (B, TT)
    out = out + b2_ref[...].astype(jnp.float32)       # (1, 1) broadcast
    out_ref[...] = out.astype(out_ref.dtype)


def pointwise_attention(target, history, w1, b1, w2, b2, *, tt=512):
    """target: (B, 1, D), history: (B, T, D) -> (B, T, 1).

    w1: (4D, D), b1: (D,), w2: (D, 1), b2: (1,)  (input-major, x @ W convention).
    """
    B, T, D = history.shape
    assert target.shape == (B, 1, D)
    assert w1.shape == (4 * D, D)

    # --- exact algebraic fold of the [history, target, diff, prod] concat ----------
    w1_hist = w1[0 * D:1 * D, :]
    w1_tgt = w1[1 * D:2 * D, :]
    w1_diff = w1[2 * D:3 * D, :]
    w1_prod = w1[3 * D:4 * D, :]
    wh = (w1_hist - w1_diff).astype(jnp.float32)      # coefficient of history
    wt = (w1_tgt + w1_diff).astype(jnp.float32)       # coefficient of target
    wp = w1_prod.astype(jnp.float32)                  # coefficient of target*history

    # Hoist the target matmul: per-batch bias = b1 + target_b @ Wt  (tiny (B,1,D) matmul).
    bias = b1[None, None, :].astype(jnp.float32) + jnp.matmul(
        target.astype(jnp.float32), wt)               # (B, 1, D)
    w2_row = w2.reshape(1, D).astype(jnp.float32)
    b2_2d = b2.reshape(1, 1).astype(jnp.float32)

    # --- tiling over T (T maps to the 128-lane axis of the output) -----------------
    T8 = _round_up(T, 8)
    tt_eff = T8 if tt >= T8 else _round_up(min(tt, T8), 128)
    T_pad = _round_up(T, tt_eff)
    grid = (T_pad // tt_eff,)

    hist_pad = history
    if T_pad != T:
        hist_pad = jnp.pad(history, ((0, 0), (0, T_pad - T), (0, 0)))

    out = pl.pallas_call(
        pointwise_attention_kernel,
        out_shape=jax.ShapeDtypeStruct((B, T_pad), jnp.float32),
        grid_spec=pltpu.PrefetchScalarGridSpec(
            num_scalar_prefetch=0,
            grid=grid,
            in_specs=[
                pl.BlockSpec((B, tt_eff, D), lambda t: (0, t, 0)),  # history tile
                pl.BlockSpec((B, 1, D), lambda t: (0, 0, 0)),       # target (resident)
                pl.BlockSpec((B, 1, D), lambda t: (0, 0, 0)),       # folded bias
                pl.BlockSpec((D, D), lambda t: (0, 0)),             # Wh
                pl.BlockSpec((D, D), lambda t: (0, 0)),             # Wp
                pl.BlockSpec((1, D), lambda t: (0, 0)),             # W2 as a row
                pl.BlockSpec((1, 1), lambda t: (0, 0)),             # b2
            ],
            out_specs=pl.BlockSpec((B, tt_eff), lambda t: (0, t)),  # lane-dense output
        ),
        compiler_params=pltpu.CompilerParams(
            dimension_semantics=("parallel",)),
    )(hist_pad, target, bias, wh, wp, w2_row, b2_2d)

    return out[:, :T].reshape(B, T, 1)


def _init_params(key, D):
    """Deterministic init matching the PyTorch parameter shapes.

    fc1: Linear(4D -> D)  => W1 (4D, D), b1 (D,)
    fc2: Linear(D  -> 1)  => W2 (D, 1),  b2 (1,)
    (stored already transposed to input-major for x @ W)
    """
    k1, k2, k3, k4 = jax.random.split(key, 4)
    lim1 = 1.0 / jnp.sqrt(4.0 * D)
    lim2 = 1.0 / jnp.sqrt(1.0 * D)
    w1 = jax.random.uniform(k1, (4 * D, D), jnp.float32, -lim1, lim1)
    b1 = jax.random.uniform(k2, (D,), jnp.float32, -lim1, lim1)
    w2 = jax.random.uniform(k3, (D, 1), jnp.float32, -lim2, lim2)
    b2 = jax.random.uniform(k4, (1,), jnp.float32, -lim2, lim2)
    return w1, b1, w2, b2


if __name__ == "__main__":
    B, T, D = 2, 8, 32  # batch, history length, embedding dim (input_dim)

    key = jax.random.PRNGKey(0)
    k_t, k_h, k_p = jax.random.split(key, 3)
    target = jax.random.normal(k_t, (B, 1, D), jnp.float32)
    history = jax.random.normal(k_h, (B, T, D), jnp.float32)
    w1, b1, w2, b2 = _init_params(k_p, D)

    out = pointwise_attention(target, history, w1, b1, w2, b2)
    out = jax.block_until_ready(out)

    # Pure-JAX reference of the original (un-folded) math, exact erf GELU.
    tgt_full = jnp.broadcast_to(target, (B, T, D))
    concat = jnp.concatenate(
        [history, tgt_full, tgt_full - history, tgt_full * history], axis=-1)
    h_ref = jax.nn.gelu(concat @ w1 + b1, approximate=False)
    ref = h_ref @ w2 + b2

    assert out.shape == (B, T, 1)
    max_err = float(jnp.max(jnp.abs(out - ref)))
    assert jnp.allclose(out, ref, atol=1e-4, rtol=1e-4), max_err

    print("KERNEL_OK")
</pallas_src>

<mosaic_0001>
module attributes {stable_mosaic.version = 11 : i64} {
  func.func @pointwise_attention_kernel(%arg0: i32, %arg1: memref<2x8x32xf32, #tpu.memory_space<vmem>>, %arg2: memref<2x1x32xf32, #tpu.memory_space<vmem>>, %arg3: memref<2x1x32xf32, #tpu.memory_space<vmem>>, %arg4: memref<32x32xf32, #tpu.memory_space<vmem>>, %arg5: memref<32x32xf32, #tpu.memory_space<vmem>>, %arg6: memref<1x32xf32, #tpu.memory_space<vmem>>, %arg7: memref<1x1xf32, #tpu.memory_space<vmem>>, %arg8: memref<2x8xf32, #tpu.memory_space<vmem>>) attributes {dimension_semantics = [#tpu.dimension_semantics<parallel>], iteration_bounds = array<i64: 1>, scalar_prefetch = 0 : i64, scratch_operands = 0 : i64, tpu.core_type = #tpu.core_type<tc>, window_params = [{transform_indices = @transform_0, window_bounds = array<i64: 2, 8, 32>}, {pipeline_mode = #tpu.pipeline_mode<synchronous>, transform_indices = @transform_1, window_bounds = array<i64: 2, 1, 32>}, {pipeline_mode = #tpu.pipeline_mode<synchronous>, transform_indices = @transform_2, window_bounds = array<i64: 2, 1, 32>}, {pipeline_mode = #tpu.pipeline_mode<synchronous>, transform_indices = @transform_3, window_bounds = array<i64: 32, 32>}, {pipeline_mode = #tpu.pipeline_mode<synchronous>, transform_indices = @transform_4, window_bounds = array<i64: 32, 32>}, {pipeline_mode = #tpu.pipeline_mode<synchronous>, transform_indices = @transform_5, window_bounds = array<i64: 1, 32>}, {pipeline_mode = #tpu.pipeline_mode<synchronous>, transform_indices = @transform_6, window_bounds = array<i64: 1, 1>}, {transform_indices = @transform_7, window_bounds = array<i64: 2, 8>}]} {
    %c0 = arith.constant 0 : index
    %c0_0 = arith.constant 0 : index
    %c0_1 = arith.constant 0 : index
    %0 = vector.load %arg1[%c0, %c0_0, %c0_1] : memref<2x8x32xf32, #tpu.memory_space<vmem>>, vector<2x8x32xf32>
    %c0_2 = arith.constant 0 : index
    %c0_3 = arith.constant 0 : index
    %c0_4 = arith.constant 0 : index
    %1 = vector.load %arg2[%c0_2, %c0_3, %c0_4] : memref<2x1x32xf32, #tpu.memory_space<vmem>>, vector<2x1x32xf32>
    %2 = vector.broadcast %1 : vector<2x1x32xf32> to vector<2x8x32xf32>
    %3 = arith.mulf %0, %2 : vector<2x8x32xf32>
    %c0_5 = arith.constant 0 : index
    %c0_6 = arith.constant 0 : index
    %4 = vector.load %arg4[%c0_5, %c0_6] : memref<32x32xf32, #tpu.memory_space<vmem>>, vector<32x32xf32>
    %c0_7 = arith.constant 0 : index
    %c0_8 = arith.constant 0 : index
    %5 = vector.load %arg5[%c0_7, %c0_8] : memref<32x32xf32, #tpu.memory_space<vmem>>, vector<32x32xf32>
    %6 = vector.shape_cast %0 : vector<2x8x32xf32> to vector<16x32xf32>
    %7 = vector.shape_cast %3 : vector<2x8x32xf32> to vector<16x32xf32>
    %cst = arith.constant dense<0.000000e+00> : vector<16x32xf32>
    %8 = tpu.matmul %6, %4, %cst {dimension_numbers = #tpu.dot_dimension_numbers<[1], [0], [0], [1], [0, 0, 1, 1], [], []>} : vector<16x32xf32>, vector<32x32xf32>, vector<16x32xf32> -> vector<16x32xf32>
    %cst_9 = arith.constant dense<0.000000e+00> : vector<16x32xf32>
    %9 = tpu.matmul %7, %5, %cst_9 {dimension_numbers = #tpu.dot_dimension_numbers<[1], [0], [0], [1], [0, 0, 1, 1], [], []>} : vector<16x32xf32>, vector<32x32xf32>, vector<16x32xf32> -> vector<16x32xf32>
    %10 = arith.addf %8, %9 : vector<16x32xf32>
    %11 = vector.shape_cast %10 : vector<16x32xf32> to vector<2x8x32xf32>
    %c0_10 = arith.constant 0 : index
    %c0_11 = arith.constant 0 : index
    %c0_12 = arith.constant 0 : index
    %12 = vector.load %arg3[%c0_10, %c0_11, %c0_12] : memref<2x1x32xf32, #tpu.memory_space<vmem>>, vector<2x1x32xf32>
    %13 = vector.broadcast %12 : vector<2x1x32xf32> to vector<2x8x32xf32>
    %14 = arith.addf %11, %13 : vector<2x8x32xf32>
    %cst_13 = arith.constant 5.000000e-01 : f32
    %15 = vector.broadcast %cst_13 : f32 to vector<2x8x32xf32>
    %16 = arith.mulf %15, %14 : vector<2x8x32xf32>
    %cst_14 = arith.constant 0.707106769 : f32
    %17 = vector.broadcast %cst_14 : f32 to vector<2x8x32xf32>
    %18 = arith.mulf %14, %17 : vector<2x8x32xf32>
    %19 = math.absf %18 : vector<2x8x32xf32>
    %cst_15 = arith.constant 0.327591091 : f32
    %20 = vector.broadcast %cst_15 : f32 to vector<2x8x32xf32>
    %21 = arith.mulf %20, %19 : vector<2x8x32xf32>
    %cst_16 = arith.constant 1.000000e+00 : f32
    %22 = vector.broadcast %cst_16 : f32 to vector<2x8x32xf32>
    %23 = arith.addf %22, %21 : vector<2x8x32xf32>
    %cst_17 = arith.constant 1.000000e+00 : f32
    %24 = vector.broadcast %cst_17 : f32 to vector<2x8x32xf32>
    %25 = arith.divf %24, %23 : vector<2x8x32xf32>
    %cst_18 = arith.constant 1.06140542 : f32
    %26 = vector.broadcast %cst_18 : f32 to vector<2x8x32xf32>
    %27 = arith.mulf %26, %25 : vector<2x8x32xf32>
    %cst_19 = arith.constant -1.45315206 : f32
    %28 = vector.broadcast %cst_19 : f32 to vector<2x8x32xf32>
    %29 = arith.addf %27, %28 : vector<2x8x32xf32>
    %30 = arith.mulf %29, %25 : vector<2x8x32xf32>
    %cst_20 = arith.constant 1.42141378 : f32
    %31 = vector.broadcast %cst_20 : f32 to vector<2x8x32xf32>
    %32 = arith.addf %30, %31 : vector<2x8x32xf32>
    %33 = arith.mulf %32, %25 : vector<2x8x32xf32>
    %cst_21 = arith.constant -0.284496725 : f32
    %34 = vector.broadcast %cst_21 : f32 to vector<2x8x32xf32>
    %35 = arith.addf %33, %34 : vector<2x8x32xf32>
    %36 = arith.mulf %35, %25 : vector<2x8x32xf32>
    %cst_22 = arith.constant 0.254829586 : f32
    %37 = vector.broadcast %cst_22 : f32 to vector<2x8x32xf32>
    %38 = arith.addf %36, %37 : vector<2x8x32xf32>
    %39 = arith.mulf %38, %25 : vector<2x8x32xf32>
    %cst_23 = arith.constant 0.000000e+00 : f32
    %40 = vector.broadcast %cst_23 : f32 to vector<2x8x32xf32>
    %41 = arith.subf %40, %19 : vector<2x8x32xf32>
    %42 = arith.mulf %41, %19 : vector<2x8x32xf32>
    %43 = math.exp %42 : vector<2x8x32xf32>
    %44 = arith.mulf %39, %43 : vector<2x8x32xf32>
    %cst_24 = arith.constant 1.000000e+00 : f32
    %45 = vector.broadcast %cst_24 : f32 to vector<2x8x32xf32>
    %46 = arith.subf %45, %44 : vector<2x8x32xf32>
    %cst_25 = arith.constant 0.000000e+00 : f32
    %47 = vector.broadcast %cst_25 : f32 to vector<2x8x32xf32>
    %48 = arith.cmpf oge, %18, %47 : vector<2x8x32xf32>
    %cst_26 = arith.constant 0.000000e+00 : f32
    %49 = vector.broadcast %cst_26 : f32 to vector<2x8x32xf32>
    %50 = arith.subf %49, %46 : vector<2x8x32xf32>
    %51 = arith.select %48, %46, %50 : vector<2x8x32xi1>, vector<2x8x32xf32>
    %cst_27 = arith.constant 1.000000e+00 : f32
    %52 = vector.broadcast %cst_27 : f32 to vector<2x8x32xf32>
    %53 = arith.addf %52, %51 : vector<2x8x32xf32>
    %54 = arith.mulf %16, %53 : vector<2x8x32xf32>
    %c0_28 = arith.constant 0 : index
    %c0_29 = arith.constant 0 : index
    %55 = vector.load %arg6[%c0_28, %c0_29] : memref<1x32xf32, #tpu.memory_space<vmem>>, vector<1x32xf32>
    %56 = vector.shape_cast %55 : vector<1x32xf32> to vector<1x1x32xf32>
    %57 = vector.broadcast %56 : vector<1x1x32xf32> to vector<2x8x32xf32>
    %58 = arith.mulf %54, %57 : vector<2x8x32xf32>
    %cst_30 = arith.constant dense<0.000000e+00> : vector<2x8xf32>
    %59 = vector.multi_reduction <add>, %58, %cst_30 [2] : vector<2x8x32xf32> to vector<2x8xf32>
    %c0_31 = arith.constant 0 : index
    %c0_32 = arith.constant 0 : index
    %60 = vector.load %arg7[%c0_31, %c0_32] : memref<1x1xf32, #tpu.memory_space<vmem>>, vector<1x1xf32>
    %61 = vector.broadcast %60 : vector<1x1xf32> to vector<2x8xf32>
    %62 = arith.addf %59, %61 : vector<2x8xf32>
    %c0_33 = arith.constant 0 : index
    %c0_34 = arith.constant 0 : index
    %63 = vector.load %arg8[%c0_33, %c0_34] : memref<2x8xf32, #tpu.memory_space<vmem>>, vector<2x8xf32>
    tpu.vector_store %arg8[%c0_33, %c0_34], %62 {strides = array<i32>} : memref<2x8xf32, #tpu.memory_space<vmem>>, vector<2x8xf32>,
    return
  }
  func.func @transform_0(%arg0: i32) -> (i32, i32, i32) {
    %c0_i32 = arith.constant 0 : i32
    %c0_i32_0 = arith.constant 0 : i32
    %c0_i32_1 = arith.constant 0 : i32
    return %c0_i32, %arg0, %c0_i32_0 : i32, i32, i32
  }
  func.func @transform_1(%arg0: i32) -> (i32, i32, i32) {
    %c0_i32 = arith.constant 0 : i32
    %c0_i32_0 = arith.constant 0 : i32
    %c0_i32_1 = arith.constant 0 : i32
    %c0_i32_2 = arith.constant 0 : i32
    return %c0_i32, %c0_i32_0, %c0_i32_1 : i32, i32, i32
  }
  func.func @transform_2(%arg0: i32) -> (i32, i32, i32) {
    %c0_i32 = arith.constant 0 : i32
    %c0_i32_0 = arith.constant 0 : i32
    %c0_i32_1 = arith.constant 0 : i32
    %c0_i32_2 = arith.constant 0 : i32
    return %c0_i32, %c0_i32_0, %c0_i32_1 : i32, i32, i32
  }
  func.func @transform_3(%arg0: i32) -> (i32, i32) {
    %c0_i32 = arith.constant 0 : i32
    %c0_i32_0 = arith.constant 0 : i32
    %c0_i32_1 = arith.constant 0 : i32
    return %c0_i32, %c0_i32_0 : i32, i32
  }
  func.func @transform_4(%arg0: i32) -> (i32, i32) {
    %c0_i32 = arith.constant 0 : i32
    %c0_i32_0 = arith.constant 0 : i32
    %c0_i32_1 = arith.constant 0 : i32
    return %c0_i32, %c0_i32_0 : i32, i32
  }
  func.func @transform_5(%arg0: i32) -> (i32, i32) {
    %c0_i32 = arith.constant 0 : i32
    %c0_i32_0 = arith.constant 0 : i32
    %c0_i32_1 = arith.constant 0 : i32
    return %c0_i32, %c0_i32_0 : i32, i32
  }
  func.func @transform_6(%arg0: i32) -> (i32, i32) {
    %c0_i32 = arith.constant 0 : i32
    %c0_i32_0 = arith.constant 0 : i32
    %c0_i32_1 = arith.constant 0 : i32
    return %c0_i32, %c0_i32_0 : i32, i32
  }
  func.func @transform_7(%arg0: i32) -> (i32, i32) {
    %c0_i32 = arith.constant 0 : i32
    %c0_i32_0 = arith.constant 0 : i32
    return %c0_i32, %arg0 : i32, i32
  }
}

</mosaic_0001>

<bundles_post_ra>
// kernel: tpu_custom_call.1
= control target key start
LH: loop header
LB: loop body
LE: loop exit
PB: predicated region body
PF: predicated region fallthrough
CT: control target
= control target key end

     0   :  { %s619_s0 = inlined_call_operand.hbm [shape: f32[2,8,32], index: 0, kind: input, shape index: {}]   ;;  %s620_s1 = inlined_call_operand.vmem [shape: f32[2,1,32], index: 1, kind: input, shape index: {}]   ;;  %s621_s2 = inlined_call_operand.vmem [shape: f32[2,1,32], index: 2, kind: input, shape index: {}]   ;;  %s622_s3 = inlined_call_operand.hbm [shape: f32[32,32], index: 3, kind: input, shape index: {}]   ;;  %s623_s4 = inlined_call_operand.hbm [shape: f32[32,32], index: 4, kind: input, shape index: {}]   ;;  %s624_s5 = inlined_call_operand.vmem [shape: f32[1,32], index: 5, kind: input, shape index: {}]   ;;  %s625_s6 = inlined_call_operand.<no memory space> [shape: f32[1,1], index: 6, kind: input, shape index: {}]   ;;  %s626_s7 = inlined_call_operand.hbm [shape: f32[2,8], index: 7, kind: output, shape index: {}]  }
   0x1   :  { %v12_v0 = vstv %s625_s6 }
   0x2   :  { %13 = vst [vmem:[#allocation2] sm:$0x1] %v12_v0 }
   0x3   :  { %14 = vsyncpa [#allocation4], 0 }
   0x4   :  { %15 = vsyncpa [#allocation7], 0 }
   0x5   :  { %16 = vsyncpa [#allocation5], 0  ;;  %s536_s26 = smov [#allocation6]   ;;  %s537_s28 = smov [#allocation3]  }
   0x6   :  { %s38_s27 = sshll.u32 %s536_s26, 4  ;;  %s22_s29 = sshll.u32 %s537_s28, 4  ;;  %s39_s27 = int_to_ptr.vmem [resolvable:$true] %s38_s27  ;;  %s23_s29 = int_to_ptr.vmem [resolvable:$true] %s22_s29 }
   0x7   :  { %s458_s30 = scalar_lea.vmem %s39_s27, 512  ;;  %p463_p1 = scmp.lt.s32.totalorder %s39_s27, %s39_s27 }
   0x8   :  { %p459_p0 = scmp.ne.s32.totalorder %s39_s27, %s458_s30  ;;  %p464_p2 = scmp.lt.s32.totalorder %s458_s30, %s458_s30 }
   0xa   :  { %p465_p3 = por %p464_p2, %p463_p1 }
   0xc   :  { %p466_p4 = pnand %p465_p3, %p459_p0 }
   0xe   :  { %469 = shalt.err (!%p466_p4)
}
   0xf   :  { %s538_s8 = smov 128   ;;  %s539_s9 = smov 8  }
  0x10   :  { %44 = dma.hbm_to_vmem [thread:$0]  %s622_s3, 512, %s39_s27, [#allocation7], %s538_s8, %s538_s8, %s539_s9  }
  0x11   :  { %s478_s11 = scalar_lea.vmem %s23_s29, 256  ;;  %p483_p6 = scmp.lt.s32.totalorder %s23_s29, %s23_s29 }
  0x12   :  { %p479_p5 = scmp.ne.s32.totalorder %s23_s29, %s478_s11  ;;  %p484_p7 = scmp.lt.s32.totalorder %s478_s11, %s478_s11 }
  0x14   :  { %p485_p8 = por %p484_p7, %p483_p6 }
  0x16   :  { %p486_p9 = pnand %p485_p8, %p479_p5 }
  0x18   :  { %489 = shalt.err (!%p486_p9)
}
  0x19   :  { %28 = dma.hbm_to_vmem [thread:$0]  %s619_s0, 256, %s23_s29, [#allocation4], %s538_s8, %s538_s8, %s539_s9  }
  0x1a   :  { %s540_s14 = smov [#allocation8]  }
  0x1b   :  { %s50_s15 = sshll.u32 %s540_s14, 4  ;;  %s51_s15 = int_to_ptr.vmem [resolvable:$true] %s50_s15 }
  0x1c   :  { %s498_s16 = scalar_lea.vmem %s51_s15, 512  ;;  %p503_p11 = scmp.lt.s32.totalorder %s51_s15, %s51_s15 }
  0x1d   :  { %p499_p10 = scmp.ne.s32.totalorder %s51_s15, %s498_s16  ;;  %p504_p12 = scmp.lt.s32.totalorder %s498_s16, %s498_s16 }
  0x1f   :  { %p505_p13 = por %p504_p12, %p503_p11 }
  0x21   :  { %p506_p0 = pnand %p505_p13, %p499_p10 }
  0x23   :  { %509 = shalt.err (!%p506_p0)
}
  0x24   :  { %56 = dma.hbm_to_vmem [thread:$0]  %s623_s4, 512, %s51_s15, [#allocation7], %s538_s8, %s538_s8, %s539_s9  }
  0x25   :  { %530 = dma.done.wait [#allocation4], 256  }
  0x26   :  { %531 = vsyncadd [#allocation4], 4294967040 }
  0x27   :  { %532 = dma.done.wait [#allocation7], 1024  }
  0x28   :  { %533 = vsyncadd [#allocation7], 4294966272  ;;  %v95_v1 = vld [vmem:[#allocation8 + $0x18] sm:$0xff]  ;;  %v94_v3 = vld [vmem:[#allocation8 + $0x10] sm:$0xff]  ;;  %vm96_vm0 = vcmask 261120   ;;  %v541_v16 = vmov 0  }
  0x29   :  { %v91_v2 = vld [vmem:[#allocation6 + $0x18] sm:$0xff]  ;;  %411 = vmatprep.subr.mxu0 %v95_v1  ;;  %v90_v4 = vld [vmem:[#allocation6 + $0x10] sm:$0xff]  ;;  %v93_v5 = vld [vmem:[#allocation8 + $0x8] sm:$0xff]  ;;  %440 = vset.pattern.permute.xlu1 %v541_v16  ;;  %s542_s24 = smov [#allocation9]   ;;  %vm368_vm3 = vcmask 1041409   ;;  %vm371_vm4 = vcmask 58368  }
  0x2a   :  { %422 = vmatprep.subr.mxu1 %v91_v2  ;;  %412 = vmatpush3.msra.mxu0 %v95_v1  ;;  %v89_v6 = vld [vmem:[#allocation6 + $0x8] sm:$0xff]  ;;  %v70_v7 = vld [vmem:[#allocation3] sm:$0xff]  ;;  %v71_v9 = vld [vmem:[#allocation3 + $0x8] sm:$0xff]  ;;  %s379_s25 = sshll.u32 %s542_s24, 4  ;;  %s380_s25 = int_to_ptr.vmem [resolvable:$true] %s379_s25 }
  0x2b   :  { %423 = vmatpush3.msra.mxu1 %v91_v2  ;;  %413 = vmatprep.subr.mxu0 %v94_v3  ;;  %v389_v8 = vld [vmem:[%s620_s1] ss:$0 sm:$0xff]  ;;  %v390_v10 = vld [vmem:[%s620_s1 + $0x1] ss:$0 sm:$0xff]  ;;  %v92_v11 = vld [vmem:[#allocation8] sm:$0xff]  ;;  %p515_p2 = scmp.lt.s32.totalorder %s380_s25, %s380_s25 }
  0x2c   :  { %424 = vmatprep.subr.mxu1 %v90_v4  ;;  %414 = vmatpush3.msra.mxu0 %v94_v3  ;;  %v88_v12 = vld [vmem:[#allocation6] sm:$0xff]  ;;  %v86_v13 = vmul.f32 %v389_v8, %v70_v7  ;;  %v87_v14 = vmul.f32 %v390_v10, %v71_v9  ;;  %v398_v15 = vld [vmem:[#allocation2] ss:$0 sm:$0xff]  ;;  %v396_v19 = vld [vmem:[%s621_s2 + $0x1] ss:$0 sm:$0xff] }
  0x2d   :  { %425 = vmatpush3.msra.mxu1 %v90_v4  ;;  %415 = vmatprep.subr.mxu0 %v93_v5  ;;  %v395_v23 = vld [vmem:[%s621_s2] ss:$0 sm:$0xff] }
  0x2e   :  { %426 = vmatprep.subr.mxu1 %v89_v6  ;;  %416 = vmatpush3.msra.mxu0 %v93_v5 }
  0x2f   :  { %427 = vmatpush3.msra.mxu1 %v89_v6  ;;  %417 = vmatprep.subr.mxu0 %v92_v11 }
  0x30   :  { %428 = vmatprep.subr.mxu1 %v88_v12  ;;  %418 = vmatpush3.msra.mxu0 %v92_v11 }
  0x31   :  { %419 = vmatprep.mubr.msk.f32.mxu0 %vm96_vm0, %v86_v13  ;;  %429 = vmatpush3.msra.mxu1 %v88_v12  ;;  %v397_v13 = vld [vmem:[%s624_s5] ss:$0 sm:$0xff]  ;;  %s510_s5 = scalar_lea.vmem %s380_s25, 32 }
  0x32   :  { %430 = vmatprep.mubr.msk.f32.mxu1 %vm96_vm0, %v70_v7  ;;  %420 = vmatmul.mubr.msk.f32.vlgmr.msra.gmra.mxu0 %vm96_vm0, %v87_v14  ;;  %p511_p1 = scmp.ne.s32.totalorder %s380_s25, %s510_s5  ;;  %p516_p3 = scmp.lt.s32.totalorder %s510_s5, %s510_s5 }
  0x33   :  { %431 = vmatmul.mubr.msk.f32.vlgmr.msra.gmra.mxu1 %vm96_vm0, %v71_v9  ;;  %441 = vset.pattern.permute.xlu0 %v541_v16 }
  0x34   :  { %351 = vperm.xlu1 %440, %v398_v15   ;;  %p517_p4 = por %p516_p3, %p515_p2 }
  0x36   :  { %p518_p5 = pnand %p517_p4, %p511_p1 }
  0xf2   :  { %v421_v17 = vpop.f32.mrf.mxu0 }
  0xf3   :  { %v432_v18 = vpop.f32.mrf.mxu1 }
  0xf4   :  { %v256_v20 = vadd.f32 %v432_v18, %v421_v17  ;;  %v169_v21 = vpop.f32.mrf.mxu0  ;;  %v358_v18 = vlaneseq }
  0xf5   :  { %v250_v22 = vpop.f32.mrf.mxu1 }
  0xf6   :  { %v274_v24 = vadd.f32 %v396_v19, %v256_v20  ;;  %v251_v25 = vadd.f32 %v250_v22, %v169_v21  ;;  %v359_v19 = vand.u32 127, %v358_v18  ;;  %v361_v20 = vshrl.u32 %v358_v18, 7  ;;  %v352_v21 = vpop.permute.xlu1 %351 }
  0xf8   :  { %v278_v26 = vmul.f32 0.70710677, %v274_v24  ;;  %v273_v27 = vadd.f32 %v395_v23, %v251_v25  ;;  %v276_v8 = vmul.f32 0.5, %v274_v24  ;;  %v362_v23 = vsub.s32 %v359_v19, %v361_v20 }
  0xfa   :  { %v280_v28 = vand.u32 2147483647, %v278_v26  ;;  %v277_v29 = vmul.f32 0.70710677, %v273_v27  ;;  %vm320_vm1 = vcmp.ge.f32.partialorder %v278_v26, 0.0  ;;  %v275_v9 = vmul.f32 0.5, %v273_v27 }
  0xfc   :  { %v282_v30 = vmul.f32 0.3275911, %v280_v28  ;;  %v279_v31 = vand.u32 2147483647, %v277_v29  ;;  %v308_v35 = vsub.f32 0.0, %v280_v28  ;;  %vm319_vm2 = vcmp.ge.f32.partialorder %v277_v29, 0.0 }
  0xfe   :  { %v284_v32 = vadd.f32 1.0, %v282_v30  ;;  %v281_v33 = vmul.f32 0.3275911, %v279_v31  ;;  %v307_v36 = vsub.f32 0.0, %v279_v31  ;;  %v310_v37 = vmul.f32 %v308_v35, %v280_v28 }
 0x100   :  { %442 = vrcp.f32 %v284_v32  ;;  %v283_v34 = vadd.f32 1.0, %v281_v33  ;;  %v309_v39 = vmul.f32 %v307_v36, %v279_v31  ;;  %v313_v40 = vmul.f32 1.442695, %v310_v37 }
 0x102   :  { %444 = vrcp.f32 %v283_v34  ;;  %v311_v44 = vmul.f32 1.442695, %v309_v39 }
 0x103   :  { %446 = vpow2.f32 %v313_v40 }
 0x104   :  { %448 = vpow2.f32 %v311_v44 }
 0x10d   :  { %v443_v38 = vpop.eup %442 }
 0x10e   :  { %v290_v41 = vmul.f32 1.0614054, %v443_v38 }
 0x10f   :  { %v445_v42 = vpop.eup %444 }
 0x110   :  { %v292_v43 = vadd.f32 -1.4531521, %v290_v41  ;;  %v289_v45 = vmul.f32 1.0614054, %v445_v42  ;;  %v447_v59 = vpop.eup %446 }
 0x111   :  { %v449_v63 = vpop.eup %448 }
 0x112   :  { %v294_v46 = vmul.f32 %v443_v38, %v292_v43  ;;  %v291_v47 = vadd.f32 -1.4531521, %v289_v45 }
 0x114   :  { %v296_v48 = vadd.f32 1.4214138, %v294_v46  ;;  %v293_v49 = vmul.f32 %v445_v42, %v291_v47 }
 0x116   :  { %v298_v50 = vmul.f32 %v443_v38, %v296_v48  ;;  %v295_v51 = vadd.f32 1.4214138, %v293_v49 }
 0x118   :  { %v300_v52 = vadd.f32 -0.28449672, %v298_v50  ;;  %v297_v53 = vmul.f32 %v445_v42, %v295_v51 }
 0x11a   :  { %v302_v54 = vmul.f32 %v443_v38, %v300_v52  ;;  %v299_v55 = vadd.f32 -0.28449672, %v297_v53 }
 0x11c   :  { %v304_v56 = vadd.f32 0.2548296, %v302_v54  ;;  %v301_v57 = vmul.f32 %v445_v42, %v299_v55 }
 0x11e   :  { %v306_v58 = vmul.f32 %v443_v38, %v304_v56  ;;  %v303_v60 = vadd.f32 0.2548296, %v301_v57 }
 0x120   :  { %v316_v61 = vmul.f32 %v447_v59, %v306_v58  ;;  %v305_v62 = vmul.f32 %v445_v42, %v303_v60 }
 0x122   :  { %v318_v0 = vsub.f32 1.0, %v316_v61  ;;  %v315_v1 = vmul.f32 %v449_v63, %v305_v62 }
 0x124   :  { %v322_v2 = vsub.f32 0.0, %v318_v0  ;;  %v317_v3 = vsub.f32 1.0, %v315_v1 }
 0x126   :  { %v324_v4 = vsel %vm320_vm1, %v318_v0, %v322_v2  ;;  %v321_v5 = vsub.f32 0.0, %v317_v3 }
 0x127   :  { %v326_v6 = vadd.f32 1.0, %v324_v4 }
 0x128   :  { %v323_v7 = vsel %vm319_vm2, %v317_v3, %v321_v5 }
 0x129   :  { %v325_v10 = vadd.f32 1.0, %v323_v7  ;;  %v328_v12 = vmul.f32 %v326_v6, %v276_v8 }
 0x12b   :  { %v327_v11 = vmul.f32 %v325_v10, %v275_v9  ;;  %v337_v16 = vmul.f32 %v397_v13, %v328_v12 }
 0x12d   :  { %v336_v14 = vmul.f32 %v397_v13, %v327_v11  ;;  %v341_v17 = vsel %vm96_vm0, %v337_v16, 0.0 }
 0x12f   :  { %v338_v15 = vsel %vm96_vm0, %v336_v14, 0.0 }
 0x130   :  { %339 = vadd.xlane.f32.xlu0 %v338_v15 }
 0x134   :  { %342 = vadd.xlane.f32.xlu0 %v341_v17 }
 0x1b9   :  { %v340_v22 = vpop.xlane.xlu0 %339 }
 0x1ba   :  { %v354_v24 = vadd.f32 %v352_v21, %v340_v22 }
 0x1bc   :  { %v363_v27 = vrot.slane %v354_v24, %v362_v23 }
 0x1bd   :  { %v343_v25 = vpop.xlane.xlu0 %342 }
 0x1be   :  { %v355_v26 = vadd.f32 %v352_v21, %v343_v25 }
 0x1c0   :  { %v367_v28 = vrot.slane %v355_v26, %v362_v23 }
 0x1c2   :  { %v369_v29 = vsel %vm368_vm3, %v367_v28, %v363_v27 }
 0x1c3   :  { %372 = vst.msk [vmem:[#allocation9] sm:$0x3] %vm371_vm4, %v369_v29 }
 0x1c4   :  { %521 = shalt.err (!%p518_p5)
}
 0x1c5   :  { %382 = dma.vmem_to_hbm [thread:$0]  %s380_s25, 32, %s626_s7, [#allocation5]  }
 0x1c6   :  { %534 = dma.done.wait [#allocation5], 32  }
 0x1c7   :  { %535 = vsyncadd [#allocation5], 4294967264 }
 0x1c8   :  { %386 = vsyncpa [#allocation4], 1 }
 0x1c9   :  { %387 = vsyncpa [#allocation7], 1 }
 0x1ca   :  { %388 = vsyncpa [#allocation5], 1 }

</bundles_post_ra>
